<compile_context>
chip_gen: v7x
topology: tpu7x:2x2x1
jax: 0.10.0
libtpu: 0.0.40
codegen_flags: <defaults>
</compile_context>

<pallas_src>
import functools

import jax
import jax.numpy as jnp
from jax.experimental import pallas as pl
from jax.experimental.pallas import tpu as pltpu


# ---------------------------------------------------------------------------
# Fused kernel: LayerNorm -> Linear (MXU) -> dropout -> residual add.
# Outputs: out = x + dropout(normed @ W + b), cache = normed.
# ---------------------------------------------------------------------------
def fused_sublayer_kernel(x_ref, g_ref, b_ref, w_ref, bias_ref, *rest,
                          eps, rate, keep_threshold, matmul_in_bf16):
    if rate > 0.0:
        rbits_ref, out_ref, cache_ref = rest
    else:
        out_ref, cache_ref = rest

    x = x_ref[...].astype(jnp.float32)                    # (tile_r, D)

    # ---- LayerNorm over the last axis (single fused reduction pass) ----
    mean = jnp.mean(x, axis=-1, keepdims=True)
    mean_sq = jnp.mean(x * x, axis=-1, keepdims=True)
    var = jnp.maximum(mean_sq - mean * mean, 0.0)         # biased var (PyTorch LN)
    inv = jax.lax.rsqrt(var + eps)
    normed = (x - mean) * inv * g_ref[...] + b_ref[...]   # gamma/beta pre-cast f32
    cache_ref[...] = normed.astype(cache_ref.dtype)

    # ---- sublayer: Linear(D, D) on the MXU (f32 accumulate) ----
    if matmul_in_bf16:
        # Optional bf16 operands for v6e/v7x MXU throughput (f32 accumulation).
        t = jnp.dot(normed.astype(jnp.bfloat16),
                    w_ref[...].astype(jnp.bfloat16),
                    preferred_element_type=jnp.float32)
    else:
        t = jnp.dot(normed, w_ref[...], preferred_element_type=jnp.float32)
    t = t + bias_ref[...]

    # ---- inverted dropout via integer threshold + select, then residual ----
    if rate > 0.0:
        # 23 uniform bits -> non-negative int32; keep iff bits >= threshold.
        masked = rbits_ref[...] & 0x7FFFFF
        keep = masked >= keep_threshold
        t = jnp.where(keep, t * (1.0 / (1.0 - rate)), 0.0)

    out_ref[...] = (x + t).astype(out_ref.dtype)


# ---------------------------------------------------------------------------
# Tile-row selection: as large as possible while fitting a conservative VMEM
# budget (safe for v7x's 64 MiB scratchpad), multiple of 8 and dividing R.
# ---------------------------------------------------------------------------
def _pick_tile_rows(R, D, has_dropout, max_rows=512,
                    vmem_budget=48 * 1024 * 1024):
    n_row_bufs = 3 + (1 if has_dropout else 0)            # x, out, cache (+ bits)
    fixed = 2 * D * D * 4                                  # double-buffered weight
    per_row = 2 * n_row_bufs * D * 4                       # double-buffered row tiles
    cap = (vmem_budget - fixed) // per_row if vmem_budget > fixed else 8
    tr = min(max_rows, R, int(max(cap, 8)))
    tr -= tr % 8
    if tr <= 0:
        tr = min(8, R)
    while tr > 8 and R % tr != 0:
        tr -= 8
    if R % tr != 0:
        tr = R                                             # single full tile fallback
    return tr


def _dropout_keep_mask(key, shape, rate):
    """Pure-JAX replica of the in-kernel keep-mask derivation (for testing)."""
    bits = jax.random.bits(key, shape, dtype=jnp.uint32)
    rbits = jax.lax.bitcast_convert_type(bits, jnp.int32)
    threshold = int(round(rate * float(1 << 23)))
    return (rbits & 0x7FFFFF) >= threshold


# ---------------------------------------------------------------------------
# Wrapper: SublayerConnectionWithCache.forward
# ---------------------------------------------------------------------------
def sublayer_connection_with_cache(x, gamma, beta, w, b, *, dropout_rate,
                                   key=None, eps=1e-5, tile_rows=None,
                                   matmul_in_bf16=False):
    B, S, D = x.shape
    R = B * S
    xf = x.reshape(R, D)
    rate = float(dropout_rate)

    if tile_rows is None:
        tile_rows = _pick_tile_rows(R, D, rate > 0.0)
    assert R % tile_rows == 0
    grid = (R // tile_rows,)

    # Pre-cast small parameter vectors once (no per-tile casts in the kernel).
    g2 = gamma.astype(jnp.float32).reshape(1, D)
    b2 = beta.astype(jnp.float32).reshape(1, D)
    bias2 = b.astype(jnp.float32).reshape(1, D)
    w32 = w.astype(jnp.float32)

    row_spec = pl.BlockSpec((tile_rows, D), lambda i: (i, 0))
    vec_spec = pl.BlockSpec((1, D), lambda i: (0, 0))
    w_spec = pl.BlockSpec((D, D), lambda i: (0, 0))        # constant index_map

    keep_threshold = int(round(rate * float(1 << 23)))

    in_arrays = [xf, g2, b2, w32, bias2]
    in_specs = [row_spec, vec_spec, vec_spec, w_spec, vec_spec]
    if rate > 0.0:
        if key is None:
            key = jax.random.PRNGKey(0)
        bits = jax.random.bits(key, (R, D), dtype=jnp.uint32)
        rbits = jax.lax.bitcast_convert_type(bits, jnp.int32)
        in_arrays.append(rbits)
        in_specs.append(row_spec)

    # Raise the scoped VMEM limit only if the working set actually needs it.
    n_row_bufs = 3 + (1 if rate > 0.0 else 0)
    est_bytes = (2 * n_row_bufs * tile_rows * D * 4 + 2 * D * D * 4
                 + 6 * D * 4)
    vmem_limit = None
    if est_bytes > 32 * 1024 * 1024:
        vmem_limit = min(int(est_bytes * 5 // 4), 60 * 1024 * 1024)

    out, cache = pl.pallas_call(
        functools.partial(fused_sublayer_kernel, eps=eps, rate=rate,
                          keep_threshold=keep_threshold,
                          matmul_in_bf16=matmul_in_bf16),
        out_shape=(jax.ShapeDtypeStruct((R, D), x.dtype),
                   jax.ShapeDtypeStruct((R, D), x.dtype)),
        grid=grid,
        in_specs=in_specs,
        out_specs=(row_spec, row_spec),
        compiler_params=pltpu.CompilerParams(
            dimension_semantics=("parallel",),      # shards across v7x's 2 TCs
            vmem_limit_bytes=vmem_limit),
    )(*in_arrays)

    return out.reshape(B, S, D), cache.reshape(B, S, D)


# ---------------------------------------------------------------------------
# Pure-JAX reference (eval mode) for correctness checks.
# ---------------------------------------------------------------------------
def reference_eval(x, gamma, beta, w, b, eps=1e-5):
    mean = jnp.mean(x, axis=-1, keepdims=True)
    var = jnp.mean((x - mean) ** 2, axis=-1, keepdims=True)
    normed = (x - mean) * jax.lax.rsqrt(var + eps) * gamma + beta
    t = normed @ w + b
    return x + t, normed


if __name__ == "__main__":
    # Small shapes implied by the module: size (= hidden) is the LayerNorm dim.
    B, S, D = 2, 8, 32
    key = jax.random.PRNGKey(0)
    kx, kg, kb, kw, kbias, kdrop = jax.random.split(key, 6)

    x = jax.random.normal(kx, (B, S, D), dtype=jnp.float32)
    gamma = jnp.ones((D,), jnp.float32) + 0.01 * jax.random.normal(kg, (D,), jnp.float32)
    beta = 0.01 * jax.random.normal(kb, (D,), dtype=jnp.float32)
    w = (jax.random.normal(kw, (D, D), dtype=jnp.float32) / jnp.sqrt(D)).astype(jnp.float32)
    b = 0.01 * jax.random.normal(kbias, (D,), dtype=jnp.float32)

    # --- eval mode (dropout = identity): compare against pure-JAX reference ---
    out0, cache0 = sublayer_connection_with_cache(x, gamma, beta, w, b,
                                                  dropout_rate=0.0)
    ref_out, ref_cache = reference_eval(x, gamma, beta, w, b)
    assert jnp.allclose(out0, ref_out, atol=1e-4, rtol=1e-4)
    assert jnp.allclose(cache0, ref_cache, atol=1e-4, rtol=1e-4)

    # --- training mode (dropout = 0.1): mask is reproducible from the key ---
    rate = 0.1
    out1, cache1 = sublayer_connection_with_cache(x, gamma, beta, w, b,
                                                  dropout_rate=rate, key=kdrop)
    keep = _dropout_keep_mask(kdrop, (B * S, D), rate).reshape(B, S, D)
    _, normed = reference_eval(x, gamma, beta, w, b)
    t_ref = normed @ w + b
    t_ref = jnp.where(keep, t_ref / (1.0 - rate), 0.0)
    ref_out1 = x + t_ref
    assert jnp.allclose(out1, ref_out1, atol=1e-4, rtol=1e-4)
    assert jnp.allclose(cache1, ref_cache, atol=1e-4, rtol=1e-4)

    jax.block_until_ready((out0, cache0, out1, cache1))
    print("KERNEL_OK")
</pallas_src>

<mosaic_0001>
module attributes {stable_mosaic.version = 11 : i64} {
  func.func @fused_sublayer_kernel(%arg0: i32, %arg1: memref<16x32xf32, #tpu.memory_space<vmem>>, %arg2: memref<1x32xf32, #tpu.memory_space<vmem>>, %arg3: memref<1x32xf32, #tpu.memory_space<vmem>>, %arg4: memref<32x32xf32, #tpu.memory_space<vmem>>, %arg5: memref<1x32xf32, #tpu.memory_space<vmem>>, %arg6: memref<16x32xf32, #tpu.memory_space<vmem>>, %arg7: memref<16x32xf32, #tpu.memory_space<vmem>>) attributes {dimension_semantics = [#tpu.dimension_semantics<parallel>], iteration_bounds = array<i64: 1>, scalar_prefetch = 0 : i64, scratch_operands = 0 : i64, tpu.core_type = #tpu.core_type<tc>, window_params = [{transform_indices = @transform_0, window_bounds = array<i64: 16, 32>}, {pipeline_mode = #tpu.pipeline_mode<synchronous>, transform_indices = @transform_1, window_bounds = array<i64: 1, 32>}, {pipeline_mode = #tpu.pipeline_mode<synchronous>, transform_indices = @transform_2, window_bounds = array<i64: 1, 32>}, {pipeline_mode = #tpu.pipeline_mode<synchronous>, transform_indices = @transform_3, window_bounds = array<i64: 32, 32>}, {pipeline_mode = #tpu.pipeline_mode<synchronous>, transform_indices = @transform_4, window_bounds = array<i64: 1, 32>}, {transform_indices = @transform_5, window_bounds = array<i64: 16, 32>}, {transform_indices = @transform_6, window_bounds = array<i64: 16, 32>}]} {
    %c0 = arith.constant 0 : index
    %c0_0 = arith.constant 0 : index
    %0 = vector.load %arg1[%c0, %c0_0] : memref<16x32xf32, #tpu.memory_space<vmem>>, vector<16x32xf32>
    %cst = arith.constant dense<0.000000e+00> : vector<16xf32>
    %1 = vector.multi_reduction <add>, %0, %cst [1] : vector<16x32xf32> to vector<16xf32>
    %2 = vector.shape_cast %1 : vector<16xf32> to vector<16x1xf32>
    %cst_1 = arith.constant 3.200000e+01 : f32
    %3 = vector.broadcast %cst_1 : f32 to vector<16x1xf32>
    %4 = arith.divf %2, %3 : vector<16x1xf32>
    %5 = arith.mulf %0, %0 : vector<16x32xf32>
    %cst_2 = arith.constant dense<0.000000e+00> : vector<16xf32>
    %6 = vector.multi_reduction <add>, %5, %cst_2 [1] : vector<16x32xf32> to vector<16xf32>
    %7 = vector.shape_cast %6 : vector<16xf32> to vector<16x1xf32>
    %cst_3 = arith.constant 3.200000e+01 : f32
    %8 = vector.broadcast %cst_3 : f32 to vector<16x1xf32>
    %9 = arith.divf %7, %8 : vector<16x1xf32>
    %10 = arith.mulf %4, %4 : vector<16x1xf32>
    %11 = arith.subf %9, %10 : vector<16x1xf32>
    %cst_4 = arith.constant 0.000000e+00 : f32
    %12 = vector.broadcast %cst_4 : f32 to vector<16x1xf32>
    %13 = arith.maximumf %11, %12 : vector<16x1xf32>
    %cst_5 = arith.constant 9.99999974E-6 : f32
    %14 = vector.broadcast %cst_5 : f32 to vector<16x1xf32>
    %15 = arith.addf %13, %14 : vector<16x1xf32>
    %16 = math.rsqrt %15 : vector<16x1xf32>
    %17 = vector.broadcast %4 : vector<16x1xf32> to vector<16x32xf32>
    %18 = arith.subf %0, %17 : vector<16x32xf32>
    %19 = vector.broadcast %16 : vector<16x1xf32> to vector<16x32xf32>
    %20 = arith.mulf %18, %19 : vector<16x32xf32>
    %c0_6 = arith.constant 0 : index
    %c0_7 = arith.constant 0 : index
    %21 = vector.load %arg2[%c0_6, %c0_7] : memref<1x32xf32, #tpu.memory_space<vmem>>, vector<1x32xf32>
    %22 = vector.broadcast %21 : vector<1x32xf32> to vector<16x32xf32>
    %23 = arith.mulf %20, %22 : vector<16x32xf32>
    %c0_8 = arith.constant 0 : index
    %c0_9 = arith.constant 0 : index
    %24 = vector.load %arg3[%c0_8, %c0_9] : memref<1x32xf32, #tpu.memory_space<vmem>>, vector<1x32xf32>
    %25 = vector.broadcast %24 : vector<1x32xf32> to vector<16x32xf32>
    %26 = arith.addf %23, %25 : vector<16x32xf32>
    %c0_10 = arith.constant 0 : index
    %c0_11 = arith.constant 0 : index
    %27 = vector.load %arg7[%c0_10, %c0_11] : memref<16x32xf32, #tpu.memory_space<vmem>>, vector<16x32xf32>
    tpu.vector_store %arg7[%c0_10, %c0_11], %26 {strides = array<i32>} : memref<16x32xf32, #tpu.memory_space<vmem>>, vector<16x32xf32>,
    %c0_12 = arith.constant 0 : index
    %c0_13 = arith.constant 0 : index
    %28 = vector.load %arg4[%c0_12, %c0_13] : memref<32x32xf32, #tpu.memory_space<vmem>>, vector<32x32xf32>
    %cst_14 = arith.constant dense<0.000000e+00> : vector<16x32xf32>
    %29 = tpu.matmul %26, %28, %cst_14 {dimension_numbers = #tpu.dot_dimension_numbers<[1], [0], [0], [1], [0, 0, 1, 1], [], []>} : vector<16x32xf32>, vector<32x32xf32>, vector<16x32xf32> -> vector<16x32xf32>
    %c0_15 = arith.constant 0 : index
    %c0_16 = arith.constant 0 : index
    %30 = vector.load %arg5[%c0_15, %c0_16] : memref<1x32xf32, #tpu.memory_space<vmem>>, vector<1x32xf32>
    %31 = vector.broadcast %30 : vector<1x32xf32> to vector<16x32xf32>
    %32 = arith.addf %29, %31 : vector<16x32xf32>
    %33 = arith.addf %0, %32 : vector<16x32xf32>
    %c0_17 = arith.constant 0 : index
    %c0_18 = arith.constant 0 : index
    %34 = vector.load %arg6[%c0_17, %c0_18] : memref<16x32xf32, #tpu.memory_space<vmem>>, vector<16x32xf32>
    tpu.vector_store %arg6[%c0_17, %c0_18], %33 {strides = array<i32>} : memref<16x32xf32, #tpu.memory_space<vmem>>, vector<16x32xf32>,
    return
  }
  func.func @transform_0(%arg0: i32) -> (i32, i32) {
    %c0_i32 = arith.constant 0 : i32
    %c0_i32_0 = arith.constant 0 : i32
    return %arg0, %c0_i32 : i32, i32
  }
  func.func @transform_1(%arg0: i32) -> (i32, i32) {
    %c0_i32 = arith.constant 0 : i32
    %c0_i32_0 = arith.constant 0 : i32
    %c0_i32_1 = arith.constant 0 : i32
    return %c0_i32, %c0_i32_0 : i32, i32
  }
  func.func @transform_2(%arg0: i32) -> (i32, i32) {
    %c0_i32 = arith.constant 0 : i32
    %c0_i32_0 = arith.constant 0 : i32
    %c0_i32_1 = arith.constant 0 : i32
    return %c0_i32, %c0_i32_0 : i32, i32
  }
  func.func @transform_3(%arg0: i32) -> (i32, i32) {
    %c0_i32 = arith.constant 0 : i32
    %c0_i32_0 = arith.constant 0 : i32
    %c0_i32_1 = arith.constant 0 : i32
    return %c0_i32, %c0_i32_0 : i32, i32
  }
  func.func @transform_4(%arg0: i32) -> (i32, i32) {
    %c0_i32 = arith.constant 0 : i32
    %c0_i32_0 = arith.constant 0 : i32
    %c0_i32_1 = arith.constant 0 : i32
    return %c0_i32, %c0_i32_0 : i32, i32
  }
  func.func @transform_5(%arg0: i32) -> (i32, i32) {
    %c0_i32 = arith.constant 0 : i32
    %c0_i32_0 = arith.constant 0 : i32
    return %arg0, %c0_i32 : i32, i32
  }
  func.func @transform_6(%arg0: i32) -> (i32, i32) {
    %c0_i32 = arith.constant 0 : i32
    %c0_i32_0 = arith.constant 0 : i32
    return %arg0, %c0_i32 : i32, i32
  }
}

</mosaic_0001>

<bundles_post_ra>
// kernel: tpu_custom_call.1
= control target key start
LH: loop header
LB: loop body
LE: loop exit
PB: predicated region body
PF: predicated region fallthrough
CT: control target
= control target key end

     0   :  { %12 = vsyncpa [#allocation3], 0  ;;  %s508_s0 = inlined_call_operand.hbm [shape: f32[16,32], index: 0, kind: input, shape index: {}]   ;;  %s509_s1 = inlined_call_operand.vmem [shape: f32[1,32], index: 1, kind: input, shape index: {}]   ;;  %s510_s2 = inlined_call_operand.vmem [shape: f32[1,32], index: 2, kind: input, shape index: {}]   ;;  %s511_s3 = inlined_call_operand.hbm [shape: f32[32,32], index: 3, kind: input, shape index: {}]   ;;  %s512_s4 = inlined_call_operand.vmem [shape: f32[1,32], index: 4, kind: input, shape index: {}]   ;;  %s513_s5 = inlined_call_operand.hbm [shape: f32[16,32], index: 5, kind: output, shape index: {0}]   ;;  %s514_s6 = inlined_call_operand.hbm [shape: f32[16,32], index: 6, kind: output, shape index: {1}]  }
   0x1   :  { %13 = vsyncpa [#allocation6], 0 }
   0x2   :  { %14 = vsyncpa [#allocation4], 0 }
   0x3   :  { %15 = vsyncpa [#allocation9], 0  ;;  %s374_s21 = smov [#allocation2]   ;;  %s278_s25 = scalar_lea.hbm %s508_s0, 256 }
   0x4   :  { %s21_s22 = sshll.u32 %s374_s21, 4  ;;  %p279_p0 = scmp.ne.s32.totalorder %s508_s0, %s278_s25  ;;  %s22_s22 = int_to_ptr.vmem [resolvable:$true] %s21_s22 }
   0x5   :  { %p282_p1 = scmp.lt.u32.totalorder %s278_s25, %s508_s0 }
   0x7   :  { %p284_p2 = pnand %p282_p1, %p279_p0 }
   0x9   :  { %287 = shalt.err (!%p284_p2)
}
   0xa   :  { %s288_s30 = scalar_lea.vmem %s22_s22, 256  ;;  %p293_p4 = scmp.lt.s32.totalorder %s22_s22, %s22_s22 }
   0xb   :  { %p289_p3 = scmp.ne.s32.totalorder %s22_s22, %s288_s30  ;;  %p294_p5 = scmp.lt.s32.totalorder %s288_s30, %s288_s30 }
   0xd   :  { %p295_p6 = por %p294_p5, %p293_p4 }
   0xf   :  { %p296_p7 = pnand %p295_p6, %p289_p3 }
  0x11   :  { %299 = shalt.err (!%p296_p7)
}
  0x12   :  { %s375_s7 = smov 128   ;;  %s376_s8 = smov 8  }
  0x13   :  { %27 = dma.hbm_to_vmem [thread:$0]  %s508_s0, 256, %s22_s22, [#allocation3], %s375_s7, %s375_s7, %s376_s8  }
  0x14   :  { %s377_s11 = smov [#allocation5]   ;;  %s300_s15 = scalar_lea.hbm %s511_s3, 512 }
  0x15   :  { %s37_s12 = sshll.u32 %s377_s11, 4  ;;  %p301_p8 = scmp.ne.s32.totalorder %s511_s3, %s300_s15  ;;  %s38_s12 = int_to_ptr.vmem [resolvable:$true] %s37_s12 }
  0x16   :  { %p304_p9 = scmp.lt.u32.totalorder %s300_s15, %s511_s3 }
  0x18   :  { %p306_p10 = pnand %p304_p9, %p301_p8 }
  0x1a   :  { %309 = shalt.err (!%p306_p10)
}
  0x1b   :  { %s310_s20 = scalar_lea.vmem %s38_s12, 512  ;;  %p315_p12 = scmp.lt.s32.totalorder %s38_s12, %s38_s12 }
  0x1c   :  { %p311_p11 = scmp.ne.s32.totalorder %s38_s12, %s310_s20  ;;  %p316_p13 = scmp.lt.s32.totalorder %s310_s20, %s310_s20 }
  0x1e   :  { %p317_p0 = por %p316_p13, %p315_p12 }
  0x20   :  { %p318_p1 = pnand %p317_p0, %p311_p11 }
  0x22   :  { %321 = shalt.err (!%p318_p1)
}
  0x23   :  { %43 = dma.hbm_to_vmem [thread:$0]  %s511_s3, 512, %s38_s12, [#allocation6], %s375_s7, %s375_s7, %s376_s8  }
  0x24   :  { %366 = dma.done.wait [#allocation3], 256  }
  0x25   :  { %367 = vsyncadd [#allocation3], 4294967040 }
  0x26   :  { %368 = dma.done.wait [#allocation6], 512  }
  0x27   :  { %369 = vsyncadd [#allocation6], 4294966784  ;;  %vm54_vm0 = vcmask 261120   ;;  %v445_v0 = vld [vmem:[#allocation2] sm:$0xff]  ;;  %v447_v1 = vld [vmem:[#allocation2 + $0x8] sm:$0xff] }
  0x28   :  { %v55_v2 = vsel %vm54_vm0, %v445_v0, 0.0  ;;  %v64_v3 = vmul.f32 %v445_v0, %v445_v0  ;;  %v65_v4 = vmul.f32 %v447_v1, %v447_v1  ;;  %v58_v6 = vsel %vm54_vm0, %v447_v1, 0.0  ;;  %v108_v8 = vld [vmem:[#allocation5] sm:$0xff]  ;;  %v109_v9 = vld [vmem:[#allocation5 + $0x8] sm:$0xff]  ;;  %v110_v10 = vld [vmem:[#allocation5 + $0x10] sm:$0xff] }
  0x29   :  { %56 = vadd.xlane.f32.xlu0 %v55_v2  ;;  %v260_v11 = vpack.c.bf16 %v109_v9, %v108_v8  ;;  %v111_v12 = vld [vmem:[#allocation5 + $0x18] sm:$0xff]  ;;  %v238_v32 = vld [vmem:[%s509_s1] ss:$0 sm:$0xff]  ;;  %s378_s1 = smov [#allocation8]  }
  0x2a   :  { %v66_v5 = vsel %vm54_vm0, %v64_v3, 0.0  ;;  %v69_v7 = vsel %vm54_vm0, %v65_v4, 0.0  ;;  %v264_v13 = vpack.c.bf16 %v111_v12, %v110_v10  ;;  %v239_v34 = vld [vmem:[%s510_s2] ss:$0 sm:$0xff]  ;;  %s221_s25 = sshll.u32 %s378_s1, 4  ;;  %s222_s25 = int_to_ptr.vmem [resolvable:$true] %s221_s25 }
  0x2b   :  { %67 = vadd.xlane.f32.xlu1 %v66_v5  ;;  %261 = vmatprep.subr.bf16.mxu0 %v260_v11  ;;  %s322_s2 = scalar_lea.vmem %s222_s25, 256  ;;  %p327_p3 = scmp.lt.s32.totalorder %s222_s25, %s222_s25 }
  0x2c   :  { %263 = vmatpush3.bf16.msra.mxu0 %v260_v11  ;;  %p323_p2 = scmp.ne.s32.totalorder %s222_s25, %s322_s2  ;;  %p328_p4 = scmp.lt.s32.totalorder %s322_s2, %s322_s2 }
  0x2d   :  { %59 = vadd.xlane.f32.xlu0 %v58_v6  ;;  %265 = vmatprep.subr.bf16.mxu0 %v264_v13 }
  0x2e   :  { %p329_p5 = por %p328_p4, %p327_p3 }
  0x2f   :  { %70 = vadd.xlane.f32.xlu1 %v69_v7 }
  0x30   :  { %267 = vmatpush3.bf16.msra.mxu0 %v264_v13  ;;  %p330_p6 = pnand %p329_p5, %p323_p2 }
  0xb6   :  { %v57_v14 = vpop.xlane.xlu0 %56 }
  0xb7   :  { %v62_v15 = vmul.f32 0.03125, %v57_v14 }
  0xb8   :  { %v68_v16 = vpop.xlane.xlu1 %67 }
  0xb9   :  { %v74_v17 = vmul.f32 %v62_v15, %v62_v15  ;;  %v72_v18 = vmul.f32 0.03125, %v68_v16  ;;  %v84_v30 = vsub.f32 %v445_v0, %v62_v15 }
  0xba   :  { %v60_v19 = vpop.xlane.xlu0 %59 }
  0xbb   :  { %v76_v20 = vsub.f32 %v72_v18, %v74_v17  ;;  %v63_v21 = vmul.f32 0.03125, %v60_v19 }
  0xbc   :  { %v71_v22 = vpop.xlane.xlu1 %70 }
  0xbd   :  { %v78_v23 = vmax.f32 %v76_v20, 0.0  ;;  %v75_v24 = vmul.f32 %v63_v21, %v63_v21  ;;  %v73_v25 = vmul.f32 0.03125, %v71_v22  ;;  %v85_v35 = vsub.f32 %v447_v1, %v63_v21 }
  0xbf   :  { %v80_v26 = vadd.f32 1e-05, %v78_v23  ;;  %v77_v27 = vsub.f32 %v73_v25, %v75_v24 }
  0xc1   :  { %274 = vrsqrt.f32 %v80_v26  ;;  %v79_v28 = vmax.f32 %v77_v27, 0.0 }
  0xc3   :  { %v81_v29 = vadd.f32 1e-05, %v79_v28 }
  0xc5   :  { %276 = vrsqrt.f32 %v81_v29 }
  0xcb   :  { %v275_v31 = vpop.eup %274 }
  0xcc   :  { %v86_v33 = vmul.f32 %v275_v31, %v84_v30 }
  0xce   :  { %v95_v36 = vmul.f32 %v238_v32, %v86_v33 }
  0xcf   :  { %v277_v37 = vpop.eup %276 }
  0xd0   :  { %v87_v38 = vmul.f32 %v277_v37, %v85_v35  ;;  %v104_v39 = vadd.f32 %v239_v34, %v95_v36 }
  0xd2   :  { %v96_v40 = vmul.f32 %v238_v32, %v87_v38  ;;  %257 = vmatprep.mubr.msk.f32.mxu0 %vm54_vm0, %v104_v39  ;;  %106 = vst.msk [vmem:[#allocation8] sm:$0xff] %vm54_vm0, %v104_v39 }
  0xd4   :  { %v105_v41 = vadd.f32 %v239_v34, %v96_v40 }
  0xd6   :  { %107 = vst.msk [vmem:[#allocation8 + $0x8] sm:$0xff] %vm54_vm0, %v105_v41  ;;  %258 = vmatmul.mubr.msk.f32.vlgmr.msra.gmra.mrb[0].mxu0 %vm54_vm0, %v105_v41 }
  0xd7   :  { %333 = shalt.err (!%p330_p6)
}
  0xd8   :  { %s334_s28 = scalar_lea.hbm %s514_s6, 256 }
  0xd9   :  { %p335_p7 = scmp.ne.s32.totalorder %s514_s6, %s334_s28  ;;  %p338_p8 = scmp.lt.u32.totalorder %s334_s28, %s514_s6 }
  0xdb   :  { %p340_p9 = pnand %p338_p8, %p335_p7 }
  0xdd   :  { %343 = shalt.err (!%p340_p9)
}
  0xde   :  { %227 = dma.vmem_to_hbm [thread:$0]  %s222_s25, 256, %s514_s6, [#allocation9], %s375_s7, %s375_s7, %s376_s8  }
  0xdf   :  { %v240_v42 = vld [vmem:[%s512_s4] ss:$0 sm:$0xff]  ;;  %s379_s15 = smov [#allocation7]  }
  0xe0   :  { %s209_s16 = sshll.u32 %s379_s15, 4  ;;  %s210_s16 = int_to_ptr.vmem [resolvable:$true] %s209_s16 }
  0xe1   :  { %s344_s6 = scalar_lea.vmem %s210_s16, 256  ;;  %p349_p11 = scmp.lt.s32.totalorder %s210_s16, %s210_s16 }
  0xe2   :  { %p345_p10 = scmp.ne.s32.totalorder %s210_s16, %s344_s6  ;;  %p350_p12 = scmp.lt.s32.totalorder %s344_s6, %s344_s6 }
  0xe4   :  { %p351_p13 = por %p350_p12, %p349_p11 }
  0xe6   :  { %p352_p0 = pnand %p351_p13, %p345_p10 }
 0x1a9   :  { %v259_v43 = vpop.f32.mrb[0].mxu0 }
 0x1aa   :  { %v197_v44 = vadd.f32 %v259_v43, %v240_v42  ;;  %v191_v45 = vpop.f32.mrb[1].mxu0 }
 0x1ab   :  { %v192_v46 = vadd.f32 %v240_v42, %v191_v45 }
 0x1ac   :  { %v201_v47 = vadd.f32 %v197_v44, %v447_v1 }
 0x1ad   :  { %v200_v48 = vadd.f32 %v192_v46, %v445_v0 }
 0x1ae   :  { %203 = vst.msk [vmem:[#allocation7 + $0x8] sm:$0xff] %vm54_vm0, %v201_v47 }
 0x1af   :  { %202 = vst.msk [vmem:[#allocation7] sm:$0xff] %vm54_vm0, %v200_v48 }
 0x1b0   :  { %355 = shalt.err (!%p352_p0)
}
 0x1b1   :  { %s356_s18 = scalar_lea.hbm %s513_s5, 256 }
 0x1b2   :  { %p357_p1 = scmp.ne.s32.totalorder %s513_s5, %s356_s18  ;;  %p360_p2 = scmp.lt.u32.totalorder %s356_s18, %s513_s5 }
 0x1b4   :  { %p362_p3 = pnand %p360_p2, %p357_p1 }
 0x1b6   :  { %365 = shalt.err (!%p362_p3)
}
 0x1b7   :  { %215 = dma.vmem_to_hbm [thread:$0]  %s210_s16, 256, %s513_s5, [#allocation4], %s375_s7, %s375_s7, %s376_s8  }
 0x1b8   :  { %370 = dma.done.wait [#allocation4], 256  }
 0x1b9   :  { %371 = vsyncadd [#allocation4], 4294967040 }
 0x1ba   :  { %372 = dma.done.wait [#allocation9], 256  }
 0x1bb   :  { %373 = vsyncadd [#allocation9], 4294967040 }
 0x1bc   :  { %234 = vsyncpa [#allocation3], 1 }
 0x1bd   :  { %235 = vsyncpa [#allocation6], 1 }
 0x1be   :  { %236 = vsyncpa [#allocation4], 1 }
 0x1bf   :  { %237 = vsyncpa [#allocation9], 1 }

</bundles_post_ra>
